<compile_context>
chip_gen: v6e
topology: v6e:2x2x1
jax: 0.10.0
libtpu: 0.0.40
codegen_flags: <defaults>
</compile_context>

<pallas_src>
import jax
import jax.numpy as jnp
from jax.experimental import pallas as pl
from jax.experimental.pallas import tpu as pltpu


# ----------------------------------------------------------------------------
# Fused Pallas kernel: whole attack model forward on one batch tile.
#   h0 = relu(x  @ W0 + b0)      # block-diagonal "all Blocks at once"
#   h1 = relu(h0 @ W1 + b1)      # encoder layer 1
#   h2 = relu(h1 @ W2 + b2)      # encoder layer 2
#   y  =      h2 @ W3p + b3p     # encoder head, zero-padded to 128 lanes
# All weights are full-block VMEM residents; intermediates are SSA values.
# ----------------------------------------------------------------------------
def _fused_attack_kernel(x_ref, w0_ref, b0_ref, w1_ref, b1_ref,
                         w2_ref, b2_ref, w3_ref, b3_ref, o_ref):
    x = x_ref[...]
    h = jnp.dot(x, w0_ref[...], preferred_element_type=jnp.float32) + b0_ref[...]
    h = jnp.maximum(h, 0.0)
    h = jnp.dot(h, w1_ref[...], preferred_element_type=jnp.float32) + b1_ref[...]
    h = jnp.maximum(h, 0.0)
    h = jnp.dot(h, w2_ref[...], preferred_element_type=jnp.float32) + b2_ref[...]
    h = jnp.maximum(h, 0.0)
    y = jnp.dot(h, w3_ref[...], preferred_element_type=jnp.float32) + b3_ref[...]
    o_ref[...] = y.astype(o_ref.dtype)


def fused_attack_forward(x, packed, *, max_batch_tile=256):
    """x: (B, sum d_i) concatenated block inputs.  Returns (B, 128) padded
    logits (first packed['n_out'] columns are the real outputs)."""
    B, K = x.shape
    # Batch tiling: single full block for small B; otherwise 256-row tiles so a
    # "parallel" grid can shard across v7x's two TensorCores.
    if B <= max_batch_tile:
        bm = B
        x_p = x
    else:
        bm = max_batch_tile
        pad = (-B) % bm
        x_p = jnp.pad(x, ((0, pad), (0, 0))) if pad else x
    Bp = x_p.shape[0]
    grid = (Bp // bm,)

    w0, b0 = packed["w0"], packed["b0"]
    w1, b1 = packed["w1"], packed["b1"]
    w2, b2 = packed["w2"], packed["b2"]
    w3, b3 = packed["w3"], packed["b3"]
    n_pad = w3.shape[1]

    full = lambda i: (0, 0)          # weights / biases: same block for every tile
    tile = lambda i: (i, 0)          # activations: march down the batch

    out = pl.pallas_call(
        _fused_attack_kernel,
        out_shape=jax.ShapeDtypeStruct((Bp, n_pad), jnp.float32),
        grid=grid,
        in_specs=[
            pl.BlockSpec((bm, K), tile),
            pl.BlockSpec(w0.shape, full), pl.BlockSpec(b0.shape, full),
            pl.BlockSpec(w1.shape, full), pl.BlockSpec(b1.shape, full),
            pl.BlockSpec(w2.shape, full), pl.BlockSpec(b2.shape, full),
            pl.BlockSpec(w3.shape, full), pl.BlockSpec(b3.shape, full),
        ],
        out_specs=pl.BlockSpec((bm, n_pad), tile),
        compiler_params=pltpu.CompilerParams(
            dimension_semantics=("parallel",)),
    )(x_p, w0, b0, w1, b1, w2, b2, w3, b3)
    return out[:B]


# ----------------------------------------------------------------------------
# Deterministic parameter init (synthetic, no checkpoint load)
# ----------------------------------------------------------------------------
def _init_linear(key, d_in, d_out):
    kw, kb = jax.random.split(key)
    scale = 1.0 / jnp.sqrt(jnp.float32(d_in))
    w = jax.random.uniform(kw, (d_in, d_out), jnp.float32, -scale, scale)
    b = jax.random.uniform(kb, (d_out,), jnp.float32, -scale, scale)
    return w, b


def init_attack_model(key, in_dims, block_hidden=64, enc_hidden=(128, 64), n_out=2):
    keys = jax.random.split(key, len(in_dims) + 3)
    blocks = [_init_linear(keys[i], d, block_hidden) for i, d in enumerate(in_dims)]
    enc_in = block_hidden * len(in_dims)
    k0, k1, k2 = keys[len(in_dims):]
    encoder = [
        _init_linear(k0, enc_in, enc_hidden[0]),
        _init_linear(k1, enc_hidden[0], enc_hidden[1]),
        _init_linear(k2, enc_hidden[1], n_out),
    ]
    return {"blocks": blocks, "encoder": encoder}


def pack_params(params, *, out_lane_pad=128):
    """One-time packing: block-diagonal first layer, (1,N) f32 biases, and a
    zero-padded (lane-dense, 128-wide) final layer."""
    blocks = params["blocks"]
    in_dims = [w.shape[0] for (w, _) in blocks]
    hid = blocks[0][0].shape[1]
    K = sum(in_dims)
    H = hid * len(blocks)

    w0 = jnp.zeros((K, H), jnp.float32)
    b0 = jnp.zeros((1, H), jnp.float32)
    r = 0
    for i, (w, b) in enumerate(blocks):
        w0 = w0.at[r:r + w.shape[0], i * hid:(i + 1) * hid].set(w.astype(jnp.float32))
        b0 = b0.at[0, i * hid:(i + 1) * hid].set(b.astype(jnp.float32))
        r += w.shape[0]

    (w1, b1), (w2, b2), (w3, b3) = params["encoder"]
    n_out = w3.shape[1]
    n_pad = max(out_lane_pad, n_out)
    w3p = jnp.zeros((w3.shape[0], n_pad), jnp.float32).at[:, :n_out].set(w3.astype(jnp.float32))
    b3p = jnp.zeros((1, n_pad), jnp.float32).at[0, :n_out].set(b3.astype(jnp.float32))

    return {
        "w0": w0, "b0": b0,
        "w1": w1.astype(jnp.float32), "b1": b1.reshape(1, -1).astype(jnp.float32),
        "w2": w2.astype(jnp.float32), "b2": b2.reshape(1, -1).astype(jnp.float32),
        "w3": w3p, "b3": b3p,
        "n_out": n_out,
    }


# ----------------------------------------------------------------------------
# Forward pass == attack_model_init.forward
# ----------------------------------------------------------------------------
def attack_model_forward(packed, input_array):
    # Block_i(x_i) + torch.cat(outputlist, 1) + encoder(...) are all fused into
    # one kernel; the only host-side glue is the (cheap) input concat and the
    # final 2-column slice of the lane-padded output.
    x = jnp.concatenate([xi.astype(jnp.float32) for xi in input_array], axis=1)
    out_padded = fused_attack_forward(x, packed)
    return out_padded[:, :packed["n_out"]]


# ----------------------------------------------------------------------------
if __name__ == "__main__":
    key = jax.random.PRNGKey(0)
    k_params, k_x0, k_x1 = jax.random.split(key, 3)

    batch = 8
    in_dims = (10, 6)          # e.g. class posteriors + auxiliary features
    params = init_attack_model(k_params, in_dims)
    packed = pack_params(params)           # one-time weight packing

    x0 = jax.random.normal(k_x0, (batch, in_dims[0]), jnp.float32)
    x1 = jax.random.normal(k_x1, (batch, in_dims[1]), jnp.float32)
    input_array = [x0, x1]

    out = attack_model_forward(packed, input_array)
    out = jax.block_until_ready(out)

    # sanity: reference in plain JAX (per-block, un-fused) must match Pallas
    def ref_forward(params, xs):
        hs = []
        for (w, b), x in zip(params["blocks"], xs):
            hs.append(jnp.maximum(x @ w + b, 0.0))
        h = jnp.concatenate(hs, axis=1)
        (w1, b1), (w2, b2), (w3, b3) = params["encoder"]
        h = jnp.maximum(h @ w1 + b1, 0.0)
        h = jnp.maximum(h @ w2 + b2, 0.0)
        return h @ w3 + b3

    ref = ref_forward(params, input_array)
    assert out.shape == (batch, 2), out.shape
    assert jnp.allclose(out, ref, atol=1e-5, rtol=1e-5), "mismatch vs reference"

    print("KERNEL_OK")
</pallas_src>

<mosaic_0001>
module attributes {stable_mosaic.version = 11 : i64} {
  func.func @_fused_attack_kernel(%arg0: i32, %arg1: memref<8x16xf32, #tpu.memory_space<vmem>>, %arg2: memref<16x128xf32, #tpu.memory_space<vmem>>, %arg3: memref<1x128xf32, #tpu.memory_space<vmem>>, %arg4: memref<128x128xf32, #tpu.memory_space<vmem>>, %arg5: memref<1x128xf32, #tpu.memory_space<vmem>>, %arg6: memref<128x64xf32, #tpu.memory_space<vmem>>, %arg7: memref<1x64xf32, #tpu.memory_space<vmem>>, %arg8: memref<64x128xf32, #tpu.memory_space<vmem>>, %arg9: memref<1x128xf32, #tpu.memory_space<vmem>>, %arg10: memref<8x128xf32, #tpu.memory_space<vmem>>) attributes {dimension_semantics = [#tpu.dimension_semantics<parallel>], iteration_bounds = array<i64: 1>, scalar_prefetch = 0 : i64, scratch_operands = 0 : i64, tpu.core_type = #tpu.core_type<tc>, window_params = [{transform_indices = @transform_0, window_bounds = array<i64: 8, 16>}, {pipeline_mode = #tpu.pipeline_mode<synchronous>, transform_indices = @transform_1, window_bounds = array<i64: 16, 128>}, {pipeline_mode = #tpu.pipeline_mode<synchronous>, transform_indices = @transform_2, window_bounds = array<i64: 1, 128>}, {pipeline_mode = #tpu.pipeline_mode<synchronous>, transform_indices = @transform_3, window_bounds = array<i64: 128, 128>}, {pipeline_mode = #tpu.pipeline_mode<synchronous>, transform_indices = @transform_4, window_bounds = array<i64: 1, 128>}, {pipeline_mode = #tpu.pipeline_mode<synchronous>, transform_indices = @transform_5, window_bounds = array<i64: 128, 64>}, {pipeline_mode = #tpu.pipeline_mode<synchronous>, transform_indices = @transform_6, window_bounds = array<i64: 1, 64>}, {pipeline_mode = #tpu.pipeline_mode<synchronous>, transform_indices = @transform_7, window_bounds = array<i64: 64, 128>}, {pipeline_mode = #tpu.pipeline_mode<synchronous>, transform_indices = @transform_8, window_bounds = array<i64: 1, 128>}, {transform_indices = @transform_9, window_bounds = array<i64: 8, 128>}]} {
    %c0 = arith.constant 0 : index
    %c0_0 = arith.constant 0 : index
    %0 = vector.load %arg1[%c0, %c0_0] : memref<8x16xf32, #tpu.memory_space<vmem>>, vector<8x16xf32>
    %c0_1 = arith.constant 0 : index
    %c0_2 = arith.constant 0 : index
    %1 = vector.load %arg2[%c0_1, %c0_2] : memref<16x128xf32, #tpu.memory_space<vmem>>, vector<16x128xf32>
    %cst = arith.constant dense<0.000000e+00> : vector<8x128xf32>
    %2 = tpu.matmul %0, %1, %cst {dimension_numbers = #tpu.dot_dimension_numbers<[1], [0], [0], [1], [0, 0, 1, 1], [], []>} : vector<8x16xf32>, vector<16x128xf32>, vector<8x128xf32> -> vector<8x128xf32>
    %c0_3 = arith.constant 0 : index
    %c0_4 = arith.constant 0 : index
    %3 = vector.load %arg3[%c0_3, %c0_4] : memref<1x128xf32, #tpu.memory_space<vmem>>, vector<1x128xf32>
    %4 = vector.broadcast %3 : vector<1x128xf32> to vector<8x128xf32>
    %5 = arith.addf %2, %4 : vector<8x128xf32>
    %cst_5 = arith.constant 0.000000e+00 : f32
    %6 = vector.broadcast %cst_5 : f32 to vector<8x128xf32>
    %7 = arith.maximumf %5, %6 : vector<8x128xf32>
    %c0_6 = arith.constant 0 : index
    %c0_7 = arith.constant 0 : index
    %8 = vector.load %arg4[%c0_6, %c0_7] : memref<128x128xf32, #tpu.memory_space<vmem>>, vector<128x128xf32>
    %cst_8 = arith.constant dense<0.000000e+00> : vector<8x128xf32>
    %9 = tpu.matmul %7, %8, %cst_8 {dimension_numbers = #tpu.dot_dimension_numbers<[1], [0], [0], [1], [0, 0, 1, 1], [], []>} : vector<8x128xf32>, vector<128x128xf32>, vector<8x128xf32> -> vector<8x128xf32>
    %c0_9 = arith.constant 0 : index
    %c0_10 = arith.constant 0 : index
    %10 = vector.load %arg5[%c0_9, %c0_10] : memref<1x128xf32, #tpu.memory_space<vmem>>, vector<1x128xf32>
    %11 = vector.broadcast %10 : vector<1x128xf32> to vector<8x128xf32>
    %12 = arith.addf %9, %11 : vector<8x128xf32>
    %cst_11 = arith.constant 0.000000e+00 : f32
    %13 = vector.broadcast %cst_11 : f32 to vector<8x128xf32>
    %14 = arith.maximumf %12, %13 : vector<8x128xf32>
    %c0_12 = arith.constant 0 : index
    %c0_13 = arith.constant 0 : index
    %15 = vector.load %arg6[%c0_12, %c0_13] : memref<128x64xf32, #tpu.memory_space<vmem>>, vector<128x64xf32>
    %cst_14 = arith.constant dense<0.000000e+00> : vector<8x64xf32>
    %16 = tpu.matmul %14, %15, %cst_14 {dimension_numbers = #tpu.dot_dimension_numbers<[1], [0], [0], [1], [0, 0, 1, 1], [], []>} : vector<8x128xf32>, vector<128x64xf32>, vector<8x64xf32> -> vector<8x64xf32>
    %c0_15 = arith.constant 0 : index
    %c0_16 = arith.constant 0 : index
    %17 = vector.load %arg7[%c0_15, %c0_16] : memref<1x64xf32, #tpu.memory_space<vmem>>, vector<1x64xf32>
    %18 = vector.broadcast %17 : vector<1x64xf32> to vector<8x64xf32>
    %19 = arith.addf %16, %18 : vector<8x64xf32>
    %cst_17 = arith.constant 0.000000e+00 : f32
    %20 = vector.broadcast %cst_17 : f32 to vector<8x64xf32>
    %21 = arith.maximumf %19, %20 : vector<8x64xf32>
    %c0_18 = arith.constant 0 : index
    %c0_19 = arith.constant 0 : index
    %22 = vector.load %arg8[%c0_18, %c0_19] : memref<64x128xf32, #tpu.memory_space<vmem>>, vector<64x128xf32>
    %cst_20 = arith.constant dense<0.000000e+00> : vector<8x128xf32>
    %23 = tpu.matmul %21, %22, %cst_20 {dimension_numbers = #tpu.dot_dimension_numbers<[1], [0], [0], [1], [0, 0, 1, 1], [], []>} : vector<8x64xf32>, vector<64x128xf32>, vector<8x128xf32> -> vector<8x128xf32>
    %c0_21 = arith.constant 0 : index
    %c0_22 = arith.constant 0 : index
    %24 = vector.load %arg9[%c0_21, %c0_22] : memref<1x128xf32, #tpu.memory_space<vmem>>, vector<1x128xf32>
    %25 = vector.broadcast %24 : vector<1x128xf32> to vector<8x128xf32>
    %26 = arith.addf %23, %25 : vector<8x128xf32>
    %c0_23 = arith.constant 0 : index
    %c0_24 = arith.constant 0 : index
    %27 = vector.load %arg10[%c0_23, %c0_24] : memref<8x128xf32, #tpu.memory_space<vmem>>, vector<8x128xf32>
    tpu.vector_store %arg10[%c0_23, %c0_24], %26 {strides = array<i32>} : memref<8x128xf32, #tpu.memory_space<vmem>>, vector<8x128xf32>,
    return
  }
  func.func @transform_0(%arg0: i32) -> (i32, i32) {
    %c0_i32 = arith.constant 0 : i32
    %c0_i32_0 = arith.constant 0 : i32
    return %arg0, %c0_i32 : i32, i32
  }
  func.func @transform_1(%arg0: i32) -> (i32, i32) {
    %c0_i32 = arith.constant 0 : i32
    %c0_i32_0 = arith.constant 0 : i32
    %c0_i32_1 = arith.constant 0 : i32
    return %c0_i32, %c0_i32_0 : i32, i32
  }
  func.func @transform_2(%arg0: i32) -> (i32, i32) {
    %c0_i32 = arith.constant 0 : i32
    %c0_i32_0 = arith.constant 0 : i32
    %c0_i32_1 = arith.constant 0 : i32
    return %c0_i32, %c0_i32_0 : i32, i32
  }
  func.func @transform_3(%arg0: i32) -> (i32, i32) {
    %c0_i32 = arith.constant 0 : i32
    %c0_i32_0 = arith.constant 0 : i32
    %c0_i32_1 = arith.constant 0 : i32
    return %c0_i32, %c0_i32_0 : i32, i32
  }
  func.func @transform_4(%arg0: i32) -> (i32, i32) {
    %c0_i32 = arith.constant 0 : i32
    %c0_i32_0 = arith.constant 0 : i32
    %c0_i32_1 = arith.constant 0 : i32
    return %c0_i32, %c0_i32_0 : i32, i32
  }
  func.func @transform_5(%arg0: i32) -> (i32, i32) {
    %c0_i32 = arith.constant 0 : i32
    %c0_i32_0 = arith.constant 0 : i32
    %c0_i32_1 = arith.constant 0 : i32
    return %c0_i32, %c0_i32_0 : i32, i32
  }
  func.func @transform_6(%arg0: i32) -> (i32, i32) {
    %c0_i32 = arith.constant 0 : i32
    %c0_i32_0 = arith.constant 0 : i32
    %c0_i32_1 = arith.constant 0 : i32
    return %c0_i32, %c0_i32_0 : i32, i32
  }
  func.func @transform_7(%arg0: i32) -> (i32, i32) {
    %c0_i32 = arith.constant 0 : i32
    %c0_i32_0 = arith.constant 0 : i32
    %c0_i32_1 = arith.constant 0 : i32
    return %c0_i32, %c0_i32_0 : i32, i32
  }
  func.func @transform_8(%arg0: i32) -> (i32, i32) {
    %c0_i32 = arith.constant 0 : i32
    %c0_i32_0 = arith.constant 0 : i32
    %c0_i32_1 = arith.constant 0 : i32
    return %c0_i32, %c0_i32_0 : i32, i32
  }
  func.func @transform_9(%arg0: i32) -> (i32, i32) {
    %c0_i32 = arith.constant 0 : i32
    %c0_i32_0 = arith.constant 0 : i32
    return %arg0, %c0_i32 : i32, i32
  }
}

</mosaic_0001>

<bundles_post_ra>
// kernel: tpu_custom_call.1
= control target key start
LH: loop header
LB: loop body
LE: loop exit
PB: predicated region body
PF: predicated region fallthrough
CT: control target
= control target key end

     0   :  { %14 = vsyncpa [#allocation3], 0  ;;  %s907_s0 = inlined_call_operand.hbm [shape: f32[8,16], index: 0, kind: input, shape index: {}]   ;;  %s908_s1 = inlined_call_operand.hbm [shape: f32[16,128], index: 1, kind: input, shape index: {}]   ;;  %s909_s2 = inlined_call_operand.vmem [shape: f32[1,128], index: 2, kind: input, shape index: {}]   ;;  %s910_s3 = inlined_call_operand.vmem [shape: f32[128,128], index: 3, kind: input, shape index: {}]   ;;  %s911_s4 = inlined_call_operand.vmem [shape: f32[1,128], index: 4, kind: input, shape index: {}]   ;;  %s912_s5 = inlined_call_operand.vmem [shape: f32[128,64], index: 5, kind: input, shape index: {}]   ;;  %s913_s6 = inlined_call_operand.vmem [shape: f32[1,64], index: 6, kind: input, shape index: {}]   ;;  %s914_s7 = inlined_call_operand.vmem [shape: f32[64,128], index: 7, kind: input, shape index: {}]   ;;  %s915_s8 = inlined_call_operand.vmem [shape: f32[1,128], index: 8, kind: input, shape index: {}]   ;;  %s916_s9 = inlined_call_operand.hbm [shape: f32[8,128], index: 9, kind: output, shape index: {}]  }
   0x1   :  { %15 = vsyncpa [#allocation6], 0 }
   0x2   :  { %16 = vsyncpa [#allocation4], 0  ;;  %s659_s30 = smov [#allocation2]   ;;  %s660_s11 = smov [#allocation5]  }
   0x3   :  { %s23_s10 = sshll.u32 %s659_s30, 4  ;;  %s32_s12 = sshll.u32 %s660_s11, 4  ;;  %s24_s10 = int_to_ptr.vmem [resolvable:$true] %s23_s10  ;;  %s33_s12 = int_to_ptr.vmem [resolvable:$true] %s32_s12 }
   0x4   :  { %s601_s13 = scalar_lea.vmem %s24_s10, 128  ;;  %p606_p1 = scmp.lt.s32.totalorder %s24_s10, %s24_s10 }
   0x5   :  { %p602_p0 = scmp.ne.s32.totalorder %s24_s10, %s601_s13  ;;  %p607_p2 = scmp.lt.s32.totalorder %s601_s13, %s601_s13 }
   0x7   :  { %p608_p3 = por %p607_p2, %p606_p1 }
   0x9   :  { %p609_p4 = pnand %p608_p3, %p602_p0 }
   0xb   :  { %612 = shalt.err (!%p609_p4)
}
   0xc   :  { %26 = dma.hbm_to_vmem [thread:$0]  %s907_s0, 128, %s24_s10, [#allocation3]  }
   0xd   :  { %s621_s16 = scalar_lea.vmem %s33_s12, 256  ;;  %p626_p6 = scmp.lt.s32.totalorder %s33_s12, %s33_s12 }
   0xe   :  { %p622_p5 = scmp.ne.s32.totalorder %s33_s12, %s621_s16  ;;  %p627_p7 = scmp.lt.s32.totalorder %s621_s16, %s621_s16 }
  0x10   :  { %p628_p8 = por %p627_p7, %p626_p6 }
  0x12   :  { %p629_p9 = pnand %p628_p8, %p622_p5 }
  0x14   :  { %632 = shalt.err (!%p629_p9)
}
  0x15   :  { %s661_s17 = smov 128   ;;  %s662_s18 = smov 8  }
  0x16   :  { %38 = dma.hbm_to_vmem [thread:$0]  %s908_s1, 256, %s33_s12, [#allocation6], %s661_s17, %s661_s17, %s662_s18  }
  0x17   :  { %653 = dma.done.wait [#allocation3], 128  }
  0x18   :  { %654 = vsyncadd [#allocation3], 4294967168 }
  0x19   :  { %655 = dma.done.wait [#allocation6], 256  }
  0x1a   :  { %656 = vsyncadd [#allocation6], 4294967040  ;;  %v663_v0 = vmov 0.0   ;;  %vm664_vm0 = vmmov 0   ;;  %v61_v1 = vld [vmem:[#allocation5 + $0x8] sm:$0xff]  ;;  %v60_v2 = vld [vmem:[#allocation5] sm:$0xff] }
  0x1b   :  { %490 = vmatprep.subr.mxu0 %v663_v0  ;;  %494 = vmatprep.mubr.msk.f32.mxu0 %vm664_vm0, %v663_v0  ;;  %v59_v3 = vld [vmem:[#allocation2] sm:$0xff]  ;;  %vm69_vm1 = vcmask 130048   ;;  %v159_v4 = vld [vmem:[%s910_s3 + $0x78] sm:$0xff]  ;;  %v158_v5 = vld [vmem:[%s910_s3 + $0x70] sm:$0xff]  ;;  %vm347_vm2 = vcmask 523264   ;;  %s665_s12 = smov [#allocation7]  }
  0x1c   :  { %497 = vmatprep.subr.mxu1 %v663_v0  ;;  %529 = vmatprep.mubr.msk.f32.mxu1 %vm664_vm0, %v663_v0  ;;  %v157_v6 = vld [vmem:[%s910_s3 + $0x68] sm:$0xff]  ;;  %v156_v7 = vld [vmem:[%s910_s3 + $0x60] sm:$0xff]  ;;  %v155_v8 = vld [vmem:[%s910_s3 + $0x58] sm:$0xff] }
  0x1d   :  { %491 = vmatpush3.msra.mxu0 %v61_v1  ;;  %498 = vmatpush3.msra.mxu1 %v159_v4  ;;  %v154_v9 = vld [vmem:[%s910_s3 + $0x50] sm:$0xff]  ;;  %v153_v10 = vld [vmem:[%s910_s3 + $0x48] sm:$0xff]  ;;  %v152_v11 = vld [vmem:[%s910_s3 + $0x40] sm:$0xff] }
  0x1e   :  { %492 = vmatprep.subr.mxu0 %v663_v0  ;;  %499 = vmatprep.subr.mxu1 %v663_v0  ;;  %v151_v12 = vld [vmem:[%s910_s3 + $0x38] sm:$0xff]  ;;  %v150_v13 = vld [vmem:[%s910_s3 + $0x30] sm:$0xff]  ;;  %v149_v14 = vld [vmem:[%s910_s3 + $0x28] sm:$0xff] }
  0x1f   :  { %493 = vmatpush3.msra.mxu0 %v60_v2  ;;  %500 = vmatpush3.msra.mxu1 %v158_v5  ;;  %v148_v15 = vld [vmem:[%s910_s3 + $0x20] sm:$0xff]  ;;  %v147_v16 = vld [vmem:[%s910_s3 + $0x18] sm:$0xff]  ;;  %v146_v17 = vld [vmem:[%s910_s3 + $0x10] sm:$0xff] }
  0x20   :  { %495 = vmatmul.mubr.msk.f32.vlgmr.msra.gmra.mxu0 %vm69_vm1, %v59_v3  ;;  %501 = vmatprep.subr.mxu1 %v663_v0  ;;  %v145_v18 = vld [vmem:[%s910_s3 + $0x8] sm:$0xff]  ;;  %v144_v19 = vld [vmem:[%s910_s3] sm:$0xff]  ;;  %v253_v20 = vld [vmem:[%s912_s5 + $0x78] sm:$0xff]  ;;  %s428_s3 = sshll.u32 %s665_s12, 4  ;;  %s429_s3 = int_to_ptr.vmem [resolvable:$true] %s428_s3 }
  0x21   :  { %532 = vmatprep.subr.mxu0 %v663_v0  ;;  %502 = vmatpush3.msra.mxu1 %v157_v6  ;;  %v252_v21 = vld [vmem:[%s912_s5 + $0x70] sm:$0xff]  ;;  %v251_v22 = vld [vmem:[%s912_s5 + $0x68] sm:$0xff]  ;;  %v250_v23 = vld [vmem:[%s912_s5 + $0x60] sm:$0xff]  ;;  %p638_p11 = scmp.lt.s32.totalorder %s429_s3, %s429_s3 }
  0x22   :  { %564 = vmatprep.mubr.msk.f32.mxu0 %vm664_vm0, %v663_v0  ;;  %503 = vmatprep.subr.mxu1 %v663_v0  ;;  %v249_v24 = vld [vmem:[%s912_s5 + $0x58] sm:$0xff]  ;;  %v248_v25 = vld [vmem:[%s912_s5 + $0x50] sm:$0xff]  ;;  %v247_v26 = vld [vmem:[%s912_s5 + $0x48] sm:$0xff] }
  0x23   :  { %504 = vmatpush3.msra.mxu1 %v156_v7  ;;  %533 = vmatpush3.msra.mxu0 %v253_v20  ;;  %v246_v27 = vld [vmem:[%s912_s5 + $0x40] sm:$0xff]  ;;  %v245_v28 = vld [vmem:[%s912_s5 + $0x38] sm:$0xff]  ;;  %v244_v29 = vld [vmem:[%s912_s5 + $0x30] sm:$0xff] }
  0x24   :  { %505 = vmatprep.subr.mxu1 %v663_v0  ;;  %534 = vmatprep.subr.mxu0 %v663_v0  ;;  %v243_v30 = vld [vmem:[%s912_s5 + $0x28] sm:$0xff]  ;;  %v242_v31 = vld [vmem:[%s912_s5 + $0x20] sm:$0xff]  ;;  %v241_v32 = vld [vmem:[%s912_s5 + $0x18] sm:$0xff] }
  0x25   :  { %506 = vmatpush3.msra.mxu1 %v155_v8  ;;  %535 = vmatpush3.msra.mxu0 %v252_v21  ;;  %v438_v33 = vld [vmem:[%s909_s2] ss:$0 sm:$0xff]  ;;  %v240_v38 = vld [vmem:[%s912_s5 + $0x10] sm:$0xff]  ;;  %v239_v39 = vld [vmem:[%s912_s5 + $0x8] sm:$0xff] }
  0x26   :  { %507 = vmatprep.subr.mxu1 %v663_v0  ;;  %536 = vmatprep.subr.mxu0 %v663_v0  ;;  %v238_v40 = vld [vmem:[%s912_s5] sm:$0xff]  ;;  %v339_v41 = vld [vmem:[%s914_s7 + $0x38] sm:$0xff]  ;;  %v338_v42 = vld [vmem:[%s914_s7 + $0x30] sm:$0xff] }
  0x27   :  { %508 = vmatpush3.msra.mxu1 %v154_v9  ;;  %537 = vmatpush3.msra.mxu0 %v251_v22  ;;  %v337_v43 = vld [vmem:[%s914_s7 + $0x28] sm:$0xff]  ;;  %v336_v44 = vld [vmem:[%s914_s7 + $0x20] sm:$0xff]  ;;  %v335_v45 = vld [vmem:[%s914_s7 + $0x18] sm:$0xff] }
  0x28   :  { %509 = vmatprep.subr.mxu1 %v663_v0  ;;  %538 = vmatprep.subr.mxu0 %v663_v0  ;;  %v440_v46 = vld [vmem:[%s911_s4] ss:$0 sm:$0xff]  ;;  %v334_v51 = vld [vmem:[%s914_s7 + $0x10] sm:$0xff]  ;;  %v333_v52 = vld [vmem:[%s914_s7 + $0x8] sm:$0xff] }
  0x29   :  { %510 = vmatpush3.msra.mxu1 %v153_v10  ;;  %539 = vmatpush3.msra.mxu0 %v250_v23  ;;  %v332_v53 = vld [vmem:[%s914_s7] sm:$0xff]  ;;  %s633_s7 = scalar_lea.vmem %s429_s3, 128 }
  0x2a   :  { %511 = vmatprep.subr.mxu1 %v663_v0  ;;  %540 = vmatprep.subr.mxu0 %v663_v0  ;;  %v441_v54 = vld [vmem:[%s913_s6] ss:$0 sm:$0xff]  ;;  %p634_p10 = scmp.ne.s32.totalorder %s429_s3, %s633_s7  ;;  %p639_p12 = scmp.lt.s32.totalorder %s633_s7, %s633_s7 }
  0x2b   :  { %512 = vmatpush3.msra.mxu1 %v152_v11  ;;  %541 = vmatpush3.msra.mxu0 %v249_v24  ;;  %v442_v59 = vld [vmem:[%s915_s8] ss:$0 sm:$0xff] }
  0x2c   :  { %513 = vmatprep.subr.mxu1 %v663_v0  ;;  %542 = vmatprep.subr.mxu0 %v663_v0  ;;  %p640_p13 = por %p639_p12, %p638_p11 }
  0x2d   :  { %514 = vmatpush3.msra.mxu1 %v151_v12  ;;  %543 = vmatpush3.msra.mxu0 %v248_v25 }
  0x2e   :  { %515 = vmatprep.subr.mxu1 %v663_v0  ;;  %544 = vmatprep.subr.mxu0 %v663_v0  ;;  %p641_p0 = pnand %p640_p13, %p634_p10 }
  0x2f   :  { %516 = vmatpush3.msra.mxu1 %v150_v13  ;;  %545 = vmatpush3.msra.mxu0 %v247_v26 }
  0x30   :  { %517 = vmatprep.subr.mxu1 %v663_v0  ;;  %546 = vmatprep.subr.mxu0 %v663_v0 }
  0x31   :  { %518 = vmatpush3.msra.mxu1 %v149_v14  ;;  %547 = vmatpush3.msra.mxu0 %v246_v27 }
  0x32   :  { %519 = vmatprep.subr.mxu1 %v663_v0  ;;  %548 = vmatprep.subr.mxu0 %v663_v0 }
  0x33   :  { %520 = vmatpush3.msra.mxu1 %v148_v15  ;;  %549 = vmatpush3.msra.mxu0 %v245_v28 }
  0x34   :  { %521 = vmatprep.subr.mxu1 %v663_v0  ;;  %550 = vmatprep.subr.mxu0 %v663_v0 }
  0x35   :  { %522 = vmatpush3.msra.mxu1 %v147_v16  ;;  %551 = vmatpush3.msra.mxu0 %v244_v29 }
  0x36   :  { %523 = vmatprep.subr.mxu1 %v663_v0  ;;  %552 = vmatprep.subr.mxu0 %v663_v0 }
  0x37   :  { %524 = vmatpush3.msra.mxu1 %v146_v17  ;;  %553 = vmatpush3.msra.mxu0 %v243_v30 }
  0x38   :  { %525 = vmatprep.subr.mxu1 %v663_v0  ;;  %554 = vmatprep.subr.mxu0 %v663_v0 }
  0x39   :  { %526 = vmatpush3.msra.mxu1 %v145_v18  ;;  %555 = vmatpush3.msra.mxu0 %v242_v31 }
  0x3a   :  { %527 = vmatprep.subr.mxu1 %v663_v0  ;;  %556 = vmatprep.subr.mxu0 %v663_v0 }
  0x3b   :  { %528 = vmatpush3.msra.mxu1 %v144_v19  ;;  %557 = vmatpush3.msra.mxu0 %v241_v32 }
  0x3c   :  { %567 = vmatprep.subr.mxu1 %v663_v0  ;;  %558 = vmatprep.subr.mxu0 %v663_v0 }
  0x3d   :  { %559 = vmatpush3.msra.mxu0 %v240_v38 }
  0x3e   :  { %560 = vmatprep.subr.mxu0 %v663_v0 }
  0x3f   :  { %561 = vmatpush3.msra.mxu0 %v239_v39 }
  0x40   :  { %562 = vmatprep.subr.mxu0 %v663_v0 }
  0x41   :  { %563 = vmatpush3.msra.mxu0 %v238_v40 }
  0xe0   :  { %v139_v34 = vpop.f32.mrf.mxu0 }
  0xe1   :  { %v140_v35 = vadd.f32 %v438_v33, %v139_v34 }
  0xe2   :  { %v496_v36 = vpop.f32.mrf.mxu0 }
  0xe3   :  { %v143_v37 = vmax.f32 %v140_v35, 0.0 }
  0xe5   :  { %530 = vmatmul.mubr.f32.vlgmr.msra.gmra.mxu1 %v143_v37 }
  0xe6   :  { %583 = vmatprep.mubr.msk.f32.mxu1 %vm664_vm0, %v663_v0  ;;  %568 = vmatpush3.msra.mxu1 %v339_v41 }
  0xe7   :  { %569 = vmatprep.subr.mxu1 %v663_v0 }
  0xe8   :  { %570 = vmatpush3.msra.mxu1 %v338_v42 }
  0xe9   :  { %571 = vmatprep.subr.mxu1 %v663_v0 }
  0xea   :  { %572 = vmatpush3.msra.mxu1 %v337_v43 }
  0xeb   :  { %573 = vmatprep.subr.mxu1 %v663_v0 }
  0xec   :  { %574 = vmatpush3.msra.mxu1 %v336_v44 }
  0xed   :  { %575 = vmatprep.subr.mxu1 %v663_v0 }
  0xee   :  { %576 = vmatpush3.msra.mxu1 %v335_v45 }
  0xef   :  { %577 = vmatprep.subr.mxu1 %v663_v0 }
  0xf0   :  { %578 = vmatpush3.msra.mxu1 %v334_v51 }
  0xf1   :  { %579 = vmatprep.subr.mxu1 %v663_v0 }
  0xf2   :  { %580 = vmatpush3.msra.mxu1 %v333_v52 }
  0xf3   :  { %581 = vmatprep.subr.mxu1 %v663_v0 }
  0xf4   :  { %582 = vmatpush3.msra.mxu1 %v332_v53 }
 0x1a5   :  { %v233_v47 = vpop.f32.mrf.mxu1 }
 0x1a6   :  { %v234_v48 = vadd.f32 %v440_v46, %v233_v47 }
 0x1a7   :  { %v531_v49 = vpop.f32.mrf.mxu1 }
 0x1a8   :  { %v237_v50 = vmax.f32 %v234_v48, 0.0 }
 0x1aa   :  { %565 = vmatmul.mubr.f32.vlgmr.msra.gmra.mxu0 %v237_v50 }
 0x26a   :  { %v327_v55 = vpop.f32.mrf.mxu0 }
 0x26b   :  { %v328_v56 = vadd.f32 %v441_v54, %v327_v55 }
 0x26c   :  { %v566_v57 = vpop.f32.mrf.mxu0 }
 0x26d   :  { %v331_v58 = vmax.f32 %v328_v56, 0.0 }
 0x26f   :  { %584 = vmatmul.mubr.msk.f32.vlgmr.msra.gmra.mxu1 %vm347_vm2, %v331_v58 }
 0x32f   :  { %v417_v60 = vpop.f32.mrf.mxu1 }
 0x330   :  { %v418_v61 = vadd.f32 %v442_v59, %v417_v60 }
 0x331   :  { %v585_v62 = vpop.f32.mrf.mxu1 }
 0x332   :  { %421 = vst [vmem:[#allocation7] sm:$0xff] %v418_v61 }
 0x333   :  { %644 = shalt.err (!%p641_p0)
}
 0x334   :  { %431 = dma.vmem_to_hbm [thread:$0]  %s429_s3, 128, %s916_s9, [#allocation4]  }
 0x335   :  { %657 = dma.done.wait [#allocation4], 128  }
 0x336   :  { %658 = vsyncadd [#allocation4], 4294967168 }
 0x337   :  { %435 = vsyncpa [#allocation3], 1 }
 0x338   :  { %436 = vsyncpa [#allocation6], 1 }
 0x339   :  { %437 = vsyncpa [#allocation4], 1 }

</bundles_post_ra>
